<compile_context>
chip_gen: v6e
topology: v6e:2x2x1
jax: 0.10.0
libtpu: 0.0.40
codegen_flags: <defaults>
</compile_context>

<pallas_src>
import jax
import jax.numpy as jnp
from jax.experimental import pallas as pl
from jax.experimental.pallas import tpu as pltpu


# ---------------------------------------------------------------------------
# Prepass: project one node set and compute 0.5 * ||row||^2 (hoisted from the
# reduction loop of the main kernel).
# ---------------------------------------------------------------------------
def proj_kernel(v_ref, w_ref, b_ref, p_ref, dh_ref):
    p = jnp.dot(v_ref[...], w_ref[...],
                preferred_element_type=jnp.float32) + b_ref[...]      # [T, E] f32
    p_ref[...] = p.astype(p_ref.dtype)                                # bf16 for MXU
    dh_ref[...] = 0.5 * jnp.sum(p * p, axis=-1, keepdims=True)        # [T, 1] f32


def _project(v_bf16, w_bf16, b_f32, *, tile):
    """Returns (proj [N,E] bf16, 0.5*||proj||^2 [N,1] f32)."""
    N, F = v_bf16.shape
    E = w_bf16.shape[1]
    tile = min(tile, N)
    assert N % tile == 0 and tile % 8 == 0
    return pl.pallas_call(
        proj_kernel,
        out_shape=(jax.ShapeDtypeStruct((N, E), jnp.bfloat16),
                   jax.ShapeDtypeStruct((N, 1), jnp.float32)),
        grid_spec=pltpu.PrefetchScalarGridSpec(
            num_scalar_prefetch=0,
            grid=(N // tile,),
            in_specs=[
                pl.BlockSpec((tile, F), lambda i: (i, 0)),
                pl.BlockSpec((F, E), lambda i: (0, 0)),     # weights VMEM-resident
                pl.BlockSpec((1, E), lambda i: (0, 0)),
            ],
            out_specs=[
                pl.BlockSpec((tile, E), lambda i: (i, 0)),
                pl.BlockSpec((tile, 1), lambda i: (i, 0)),
            ],
        ),
        compiler_params=pltpu.CompilerParams(
            dimension_semantics=("parallel",),
            vmem_limit_bytes=32 * 1024 * 1024,
        ),
    )(v_bf16, w_bf16, b_f32)


# ---------------------------------------------------------------------------
# Main kernel: score / normalize / accumulate A^T @ xp / final projection.
# grid = (Ny // TNY  "parallel",  Nx // TNX  "arbitrary" reduction)
# ---------------------------------------------------------------------------
def qv_kernel(xp_ref, dxh_t_ref, yp_ref, dyh_ref, wg_ref, bg_ref, out_ref, acc_s):
    i = pl.program_id(1)

    @pl.when(i == 0)
    def _():
        acc_s[...] = jnp.zeros_like(acc_s)

    # S^T[j,i] = <yp_j, xp_i>: contract last dims of both -> already transposed,
    # no XLU relayout.
    s_t = jax.lax.dot_general(
        yp_ref[...], xp_ref[...],
        dimension_numbers=(((1,), (1,)), ((), ())),
        preferred_element_type=jnp.float32)                           # [TNY, TNX]

    # A^T = 2*S^T / (||xp_i||^2 + ||yp_j||^2) = S^T * recip(0.5*dx_i + 0.5*dy_j)
    # dyh: [TNY,1] f32 column,  dxh_t: [1,TNX] f32 row (already transposed, hoisted).
    denom = dyh_ref[...] + dxh_t_ref[...]                              # [TNY, TNX]
    a_t = s_t * pl.reciprocal(denom, approx=True)                      # EUP path

    # Accumulate A^T @ xp into the resident f32 scratch.
    acc_s[...] += jnp.dot(a_t.astype(jnp.bfloat16), xp_ref[...],
                          preferred_element_type=jnp.float32)          # [TNY, E]

    @pl.when(i == pl.num_programs(1) - 1)
    def _():
        feats = jnp.dot(acc_s[...].astype(jnp.bfloat16), wg_ref[...],
                        preferred_element_type=jnp.float32) + bg_ref[...]
        out_ref[...] = jnp.maximum(feats, 0.0).astype(out_ref.dtype)


def base_qv_layer(x, y, params, *, tile_nx=256, tile_ny=256):
    """x: [Nx, Fx] f32, y: [Ny, Fy] f32 -> [Ny, emb_out] f32."""
    Nx, _ = x.shape
    Ny, _ = y.shape
    E = params["wpx"].shape[1]
    Eo = params["wg"].shape[1]

    tile_nx = min(tile_nx, Nx)
    tile_ny = min(tile_ny, Ny)
    assert Nx % tile_nx == 0 and Ny % tile_ny == 0, "pad Nx/Ny to tile multiples"
    assert tile_nx % 128 == 0 or tile_nx == Nx
    assert tile_ny % 8 == 0

    # Pre-cast weights & inputs to bf16 (halves HBM traffic, feeds MXU at bf16
    # rate); biases stay f32 and add into f32 accumulators.
    wpx = params["wpx"].astype(jnp.bfloat16)
    wpy = params["wpy"].astype(jnp.bfloat16)
    wg = params["wg"].astype(jnp.bfloat16)
    bpx, bpy, bg = params["bpx"], params["bpy"], params["bg"]

    # --- prepass: projections + 0.5*||.||^2 (out of the reduction loop) ---
    xp, dxh = _project(x.astype(jnp.bfloat16), wpx, bpx, tile=tile_nx)   # [Nx,E], [Nx,1]
    yp, dyh = _project(y.astype(jnp.bfloat16), wpy, bpy, tile=tile_ny)   # [Ny,E], [Ny,1]
    dxh_t = jnp.reshape(dxh, (1, Nx))   # row layout: kills per-step [TNX,1]->[1,TNX]

    grid = (Ny // tile_ny, Nx // tile_nx)

    # Advisory cost: only the main kernel's work; bytes include the Ny/tile_ny
    # re-reads of xp / dxh_t (the dominant HBM term for large N).
    n_passes = Ny // tile_ny
    flops = 4 * Nx * Ny * E + 2 * Ny * E * Eo
    bytes_accessed = (n_passes * (Nx * E * 2 + Nx * 4)      # xp, dxh_t re-streamed
                      + Ny * E * 2 + Ny * 4                  # yp, dyh
                      + wg.size * 2 + bg.size * 4
                      + Ny * Eo * 4)

    grid_spec = pltpu.PrefetchScalarGridSpec(
        num_scalar_prefetch=0,
        grid=grid,
        in_specs=[
            pl.BlockSpec((tile_nx, E), lambda j, i: (i, 0)),   # xp block (reduction)
            pl.BlockSpec((1, tile_nx), lambda j, i: (0, i)),   # 0.5*||xp||^2, row layout
            pl.BlockSpec((tile_ny, E), lambda j, i: (j, 0)),   # yp block (output rows)
            pl.BlockSpec((tile_ny, 1), lambda j, i: (j, 0)),   # 0.5*||yp||^2
            pl.BlockSpec((E, Eo), lambda j, i: (0, 0)),        # Wg: VMEM-resident
            pl.BlockSpec((1, Eo), lambda j, i: (0, 0)),        # bg
        ],
        out_specs=pl.BlockSpec((tile_ny, Eo), lambda j, i: (j, 0)),
        scratch_shapes=[
            pltpu.VMEM((tile_ny, E), jnp.float32),             # f32 acc for A^T @ xp
        ],
    )

    return pl.pallas_call(
        qv_kernel,
        out_shape=jax.ShapeDtypeStruct((Ny, Eo), jnp.float32),
        grid_spec=grid_spec,
        compiler_params=pltpu.CompilerParams(
            dimension_semantics=("parallel", "arbitrary"),
            vmem_limit_bytes=32 * 1024 * 1024,
        ),
        cost_estimate=pl.CostEstimate(
            flops=flops, transcendentals=Nx * Ny, bytes_accessed=bytes_accessed),
    )(xp, dxh_t, yp, dyh, wg, bg)


# ---------------------------------------------------------------------------
# Pure-JAX f32 reference (matches the PyTorch forward exactly).
# ---------------------------------------------------------------------------
def base_qv_layer_ref(x, y, p):
    xp = x @ p["wpx"] + p["bpx"]
    yp = y @ p["wpy"] + p["bpy"]
    A_ = xp @ yp.T
    dx = jnp.sum(xp * xp, axis=-1, keepdims=True)   # diag(xp xp^T)
    dy = jnp.sum(yp * yp, axis=-1, keepdims=True)   # diag(yp yp^T)
    A = 2.0 * A_ / (dx + dy.T)                      # zero-norm rows -> inf/nan, as in torch
    gwf = A.T @ xp
    return jax.nn.relu(gwf @ p["wg"] + p["bg"])


def make_params(key, feat_x, feat_y, emb, emb_out):
    ks = jax.random.split(key, 6)
    s = 0.1
    # nn.Linear weights stored pre-transposed as [in, out]; biases as [1, out].
    return {
        "wpx": jax.random.normal(ks[0], (feat_x, emb), jnp.float32) * s,
        "bpx": jax.random.normal(ks[1], (1, emb), jnp.float32) * s,
        "wpy": jax.random.normal(ks[2], (feat_y, emb), jnp.float32) * s,
        "bpy": jax.random.normal(ks[3], (1, emb), jnp.float32) * s,
        "wg":  jax.random.normal(ks[4], (emb, emb_out), jnp.float32) * s,
        "bg":  jax.random.normal(ks[5], (1, emb_out), jnp.float32) * s,
    }


if __name__ == "__main__":
    # Shapes chosen so the 256-tiles give grid (2, 2): the "parallel" row axis
    # keeps >= 2 blocks (v7x: both TensorCores busy) and the reduction axis is
    # exercised. Output is lane-dense (Eo = 128).
    NX, NY = 512, 512
    FEAT_X, FEAT_Y, EMB, EMB_OUT = 32, 48, 64, 128

    key = jax.random.PRNGKey(0)
    kx, ky, kp = jax.random.split(key, 3)
    x = jax.random.normal(kx, (NX, FEAT_X), jnp.float32)
    y = jax.random.normal(ky, (NY, FEAT_Y), jnp.float32)
    params = make_params(kp, FEAT_X, FEAT_Y, EMB, EMB_OUT)

    out = base_qv_layer(x, y, params, tile_nx=256, tile_ny=256)
    out = jax.block_until_ready(out)

    ref = base_qv_layer_ref(x, y, params)
    assert out.shape == (NY, EMB_OUT)
    # bf16 MXU operands + approx reciprocal over a 512-long reduction -> relaxed
    # tolerance vs the f32 reference.
    assert jnp.allclose(out, ref, atol=1e-1, rtol=5e-2), "mismatch vs JAX reference"
    print("KERNEL_OK")
</pallas_src>

<mosaic_0001>
module attributes {stable_mosaic.version = 11 : i64} {
  func.func @proj_kernel(%arg0: i32, %arg1: memref<256x32xbf16, #tpu.memory_space<vmem>>, %arg2: memref<32x64xbf16, #tpu.memory_space<vmem>>, %arg3: memref<1x64xf32, #tpu.memory_space<vmem>>, %arg4: memref<256x64xbf16, #tpu.memory_space<vmem>>, %arg5: memref<256x1xf32, #tpu.memory_space<vmem>>) attributes {dimension_semantics = [#tpu.dimension_semantics<parallel>], iteration_bounds = array<i64: 2>, scalar_prefetch = 0 : i64, scratch_operands = 0 : i64, tpu.core_type = #tpu.core_type<tc>, window_params = [{transform_indices = @transform_0, window_bounds = array<i64: 256, 32>}, {pipeline_mode = #tpu.pipeline_mode<synchronous>, transform_indices = @transform_1, window_bounds = array<i64: 32, 64>}, {pipeline_mode = #tpu.pipeline_mode<synchronous>, transform_indices = @transform_2, window_bounds = array<i64: 1, 64>}, {transform_indices = @transform_3, window_bounds = array<i64: 256, 64>}, {transform_indices = @transform_4, window_bounds = array<i64: 256, 1>}]} {
    %c0 = arith.constant 0 : index
    %c0_0 = arith.constant 0 : index
    %0 = vector.load %arg1[%c0, %c0_0] : memref<256x32xbf16, #tpu.memory_space<vmem>>, vector<256x32xbf16>
    %c0_1 = arith.constant 0 : index
    %c0_2 = arith.constant 0 : index
    %1 = vector.load %arg2[%c0_1, %c0_2] : memref<32x64xbf16, #tpu.memory_space<vmem>>, vector<32x64xbf16>
    %cst = arith.constant dense<0.000000e+00> : vector<256x64xf32>
    %2 = tpu.matmul %0, %1, %cst {dimension_numbers = #tpu.dot_dimension_numbers<[1], [0], [0], [1], [0, 0, 1, 1], [], []>} : vector<256x32xbf16>, vector<32x64xbf16>, vector<256x64xf32> -> vector<256x64xf32>
    %c0_3 = arith.constant 0 : index
    %c0_4 = arith.constant 0 : index
    %3 = vector.load %arg3[%c0_3, %c0_4] : memref<1x64xf32, #tpu.memory_space<vmem>>, vector<1x64xf32>
    %4 = vector.broadcast %3 : vector<1x64xf32> to vector<256x64xf32>
    %5 = arith.addf %2, %4 : vector<256x64xf32>
    %6 = arith.truncf %5 : vector<256x64xf32> to vector<256x64xbf16>
    %c0_5 = arith.constant 0 : index
    %c0_6 = arith.constant 0 : index
    %7 = vector.load %arg4[%c0_5, %c0_6] : memref<256x64xbf16, #tpu.memory_space<vmem>>, vector<256x64xbf16>
    tpu.vector_store %arg4[%c0_5, %c0_6], %6 {strides = array<i32>} : memref<256x64xbf16, #tpu.memory_space<vmem>>, vector<256x64xbf16>,
    %8 = arith.mulf %5, %5 : vector<256x64xf32>
    %cst_7 = arith.constant dense<0.000000e+00> : vector<256xf32>
    %9 = vector.multi_reduction <add>, %8, %cst_7 [1] : vector<256x64xf32> to vector<256xf32>
    %10 = vector.shape_cast %9 : vector<256xf32> to vector<256x1xf32>
    %cst_8 = arith.constant 5.000000e-01 : f32
    %11 = vector.broadcast %cst_8 : f32 to vector<256x1xf32>
    %12 = arith.mulf %11, %10 : vector<256x1xf32>
    %c0_9 = arith.constant 0 : index
    %c0_10 = arith.constant 0 : index
    %13 = vector.load %arg5[%c0_9, %c0_10] : memref<256x1xf32, #tpu.memory_space<vmem>>, vector<256x1xf32>
    tpu.vector_store %arg5[%c0_9, %c0_10], %12 {strides = array<i32>} : memref<256x1xf32, #tpu.memory_space<vmem>>, vector<256x1xf32>,
    return
  }
  func.func @transform_0(%arg0: i32) -> (i32, i32) {
    %c0_i32 = arith.constant 0 : i32
    %c0_i32_0 = arith.constant 0 : i32
    return %arg0, %c0_i32 : i32, i32
  }
  func.func @transform_1(%arg0: i32) -> (i32, i32) {
    %c0_i32 = arith.constant 0 : i32
    %c0_i32_0 = arith.constant 0 : i32
    %c0_i32_1 = arith.constant 0 : i32
    return %c0_i32, %c0_i32_0 : i32, i32
  }
  func.func @transform_2(%arg0: i32) -> (i32, i32) {
    %c0_i32 = arith.constant 0 : i32
    %c0_i32_0 = arith.constant 0 : i32
    %c0_i32_1 = arith.constant 0 : i32
    return %c0_i32, %c0_i32_0 : i32, i32
  }
  func.func @transform_3(%arg0: i32) -> (i32, i32) {
    %c0_i32 = arith.constant 0 : i32
    %c0_i32_0 = arith.constant 0 : i32
    return %arg0, %c0_i32 : i32, i32
  }
  func.func @transform_4(%arg0: i32) -> (i32, i32) {
    %c0_i32 = arith.constant 0 : i32
    %c0_i32_0 = arith.constant 0 : i32
    return %arg0, %c0_i32 : i32, i32
  }
}

</mosaic_0001>

<bundles_post_ra>
// kernel: tpu_custom_call.1
= control target key start
LH: loop header
LB: loop body
LE: loop exit
PB: predicated region body
PF: predicated region fallthrough
CT: control target
= control target key end

     0   :  { %s1235_s15 = smov 0   ;;  %s1594_s0 = inlined_call_operand.vmem [shape: bf16[512,32], index: 0, kind: input, shape index: {}]   ;;  %s1595_s1 = inlined_call_operand.vmem [shape: bf16[32,64], index: 1, kind: input, shape index: {}]   ;;  %s1596_s2 = inlined_call_operand.vmem [shape: f32[1,64], index: 2, kind: input, shape index: {}]   ;;  %s1597_s3 = inlined_call_operand.vmem [shape: bf16[512,64], index: 3, kind: output, shape index: {0}]   ;;  %s1598_s4 = inlined_call_operand.vmem [shape: f32[512,1], index: 4, kind: output, shape index: {1}]  }
   0x1 LB: > { %s1006_s16 = sadd.s32 4294967295, %s1208_s15   ;;  %p1010_p0 = scmp.ge.s32.totalorder %s1208_s15, 1  ;;  %s1208_s15 = sphi %s1235_s15, %s15_s15  }
   0x2   : > { %p166_p1 = scmp.lt.s32.totalorder %s1208_s15, 3 }
   0x4   : > { %p167_p2 = pnand %p1010_p0, %p166_p1 }
   0x5   : > { %s1011_s19 = sshll.u32 (!%p167_p2), %s1006_s16, 5 }
   0x6   : > { %170 = sbr.rel (%p167_p2) target bundleno = 420 (0x1a4), region = 32  ;;  %p198_p3 = scmp.lt.s32.totalorder (!%p167_p2), %s1011_s19, 63 }
   0xb   : > { %v1184_v0 = vld [vmem:[%s1595_s1 + $0x8] sm:$0xff]   ;;  %v1185_v1 = vld [vmem:[%s1595_s1] sm:$0xff]   ;;  %s1600_s19 = smov (!%p198_p3, %s1011_s19), 63  ;;  %vm351_vm0 = vcmask 261120   ;;  %vm689_vm1 = vcmask 519168   ;;  %vm754_vm2 = vcmask 523264  }
   0xc   : > { %1136 = vmatprep.subr.bf16.mxu0 %v1184_v0  ;;  %1172 = vmatprep.subr.bf16.mxu1 %v1184_v0  ;;  %s1012_s22 = sshll.u32 %s1600_s19, 2  ;;  %v1294_v18 = vld [vmem:[%s1596_s2] ss:$0 sm:$0xff]  ;;  %s1016_s5 = sshll.u32 %s1600_s19, 3  ;;  %vm883_vm3 = vcmask 7168  }
   0xd   : > { %1137 = vmatpush3.bf16.msra.mxu0 %v1184_v0  ;;  %1174 = vmatpush3.bf16.msra.mxu1 %v1184_v0  ;;  %s1257_s25 = scalar_lea.vmem %s1594_s0, %s1012_s22  ;;  %s1302_s30 = scalar_lea.vmem %s1597_s3, %s1012_s22 }
   0xe   : > { %1138 = vmatprep.subr.bf16.mxu0 %v1185_v1  ;;  %1173 = vmatprep.subr.bf16.mxu1 %v1185_v1  ;;  %v1186_v2 = vld [vmem:[%s1257_s25] sm:$0xff]   ;;  %v1188_v4 = vld [vmem:[%s1257_s25 + $0x8] sm:$0xff]   ;;  %v1190_v6 = vld [vmem:[%s1257_s25 + $0x10] sm:$0xff]   ;;  %s1525_s8 = scalar_lea.vmem %s1598_s4, %s1016_s5 }
   0xf   : > { %v1187_v3 = vld [vmem:[%s1257_s25 + $0x40] sm:$0xff]   ;;  %1140 = vmatprep.mubr.msk.bf16.mxu0 %vm351_vm0, %v1186_v2  ;;  %v1189_v5 = vld [vmem:[%s1257_s25 + $0x48] sm:$0xff]   ;;  %v1192_v7 = vld [vmem:[%s1257_s25 + $0x50] sm:$0xff]  }
  0x10   : > { %1156 = vmatprep.mubr.msk.bf16.mxu1 %vm351_vm0, %v1187_v3  ;;  %v1191_v8 = vld [vmem:[%s1257_s25 + $0x18] sm:$0xff]   ;;  %v1194_v10 = vld [vmem:[%s1257_s25 + $0x20] sm:$0xff]   ;;  %v1195_v12 = vld [vmem:[%s1257_s25 + $0x28] sm:$0xff]  }
  0x11   : > { %1139 = vmatpush3.bf16.msra.mxu0 %v1185_v1  ;;  %1175 = vmatpush3.bf16.msra.mxu1 %v1185_v1  ;;  %v1193_v9 = vld [vmem:[%s1257_s25 + $0x58] sm:$0xff]   ;;  %v1196_v11 = vld [vmem:[%s1257_s25 + $0x60] sm:$0xff]   ;;  %v1197_v13 = vld [vmem:[%s1257_s25 + $0x68] sm:$0xff]  }
  0x12   : > { %v1198_v14 = vld [vmem:[%s1257_s25 + $0x30] sm:$0xff]   ;;  %v1199_v16 = vld [vmem:[%s1257_s25 + $0x38] sm:$0xff]  }
  0x13   : > { %v1200_v15 = vld [vmem:[%s1257_s25 + $0x70] sm:$0xff]   ;;  %v1201_v17 = vld [vmem:[%s1257_s25 + $0x78] sm:$0xff]  }
  0x14   : > { %1141 = vmatmul.mubr.msk.bf16.vlgmr.msra.gmra.mxu0 %vm351_vm0, %v1188_v4  ;;  %1157 = vmatmul.mubr.msk.bf16.vlgmr.msra.gmra.mxu1 %vm351_vm0, %v1189_v5 }
  0x15   : > { %1144 = vmatprep.mubr.msk.bf16.mxu0 %vm351_vm0, %v1190_v6  ;;  %1160 = vmatprep.mubr.msk.bf16.mxu1 %vm351_vm0, %v1192_v7 }
  0x1c   : > { %1145 = vmatmul.mubr.msk.bf16.gmra.mxu0 %vm351_vm0, %v1191_v8  ;;  %1161 = vmatmul.mubr.msk.bf16.gmra.mxu1 %vm351_vm0, %v1193_v9 }
  0x1d   : > { %1148 = vmatprep.mubr.msk.bf16.mxu0 %vm351_vm0, %v1194_v10  ;;  %1164 = vmatprep.mubr.msk.bf16.mxu1 %vm351_vm0, %v1196_v11 }
  0x24   : > { %1149 = vmatmul.mubr.msk.bf16.gmra.mxu0 %vm351_vm0, %v1195_v12  ;;  %1165 = vmatmul.mubr.msk.bf16.gmra.mxu1 %vm351_vm0, %v1197_v13 }
  0x25   : > { %1152 = vmatprep.mubr.msk.bf16.mxu0 %vm351_vm0, %v1198_v14  ;;  %1168 = vmatprep.mubr.msk.bf16.mxu1 %vm351_vm0, %v1200_v15 }
  0x2c   : > { %1153 = vmatmul.mubr.msk.bf16.gmra.mxu0 %vm351_vm0, %v1199_v16  ;;  %1169 = vmatmul.mubr.msk.bf16.gmra.mxu1 %vm351_vm0, %v1201_v17 }
  0xd4   : > { %v1142_v19 = vpop.f32.mrf.mxu0  ;;  %v1158_v21 = vpop.f32.mrf.mxu1 }
  0xd5   : > { %v443_v20 = vadd.f32 %v1142_v19, %v1294_v18  ;;  %v507_v22 = vadd.f32 %v1158_v21, %v1294_v18 }
  0xd6   : > { %v434_v23 = vpop.f32.mrf.mxu0  ;;  %v498_v26 = vpop.f32.mrf.mxu1 }
  0xd7   : > { %v1088_v24 = vpack.c.bf16 %v443_v20, %v443_v20  ;;  %v435_v25 = vadd.f32 %v1294_v18, %v434_v23  ;;  %v724_v27 = vmul.f32 %v443_v20, %v443_v20  ;;  %v1104_v28 = vpack.c.bf16 %v507_v22, %v507_v22 }
  0xd8   : > { %v499_v29 = vadd.f32 %v1294_v18, %v498_v26  ;;  %v1143_v30 = vpop.f32.mrf.mxu0  ;;  %v740_v31 = vmul.f32 %v507_v22, %v507_v22  ;;  %v1159_v34 = vpop.f32.mrf.mxu1 }
  0xd9   : > { %692 = vst.msk [vmem:[%s1302_s30 + $0x8] sm:$0xf] %vm689_vm1, %v1088_v24  ;;  %v1086_v32 = vpack.c.bf16 %v435_v25, %v435_v25  ;;  %v446_v33 = vadd.f32 %v1143_v30, %v1294_v18  ;;  %v761_v35 = vsel %vm754_vm2, %v724_v27, 0.0  ;;  %708 = vst.msk [vmem:[%s1302_s30 + $0x48] sm:$0xf] %vm689_vm1, %v1104_v28  ;;  %v510_v37 = vadd.f32 %v1159_v34, %v1294_v18 }
  0xda   : > { %v1102_v36 = vpack.c.bf16 %v499_v29, %v499_v29  ;;  %v809_v38 = vsel %vm754_vm2, %v740_v31, 0.0  ;;  %762 = vadd.xlane.f32.xlu1 %v761_v35  ;;  %v437_v39 = vpop.f32.mrf.mxu0  ;;  %v722_v40 = vmul.f32 %v435_v25, %v435_v25  ;;  %v501_v42 = vpop.f32.mrf.mxu1  ;;  %v738_v57 = vmul.f32 %v499_v29, %v499_v29 }
  0xdb   : > { %690 = vst.msk [vmem:[%s1302_s30] sm:$0xf] %vm689_vm1, %v1086_v32  ;;  %v1089_v41 = vpack.c.bf16 %v446_v33, %v446_v33  ;;  %810 = vadd.xlane.f32.xlu0 %v809_v38  ;;  %v438_v43 = vadd.f32 %v1294_v18, %v437_v39  ;;  %v725_v44 = vmul.f32 %v446_v33, %v446_v33 }
  0xdc   : > { %706 = vst.msk [vmem:[%s1302_s30 + $0x40] sm:$0xf] %vm689_vm1, %v1102_v36  ;;  %v1105_v45 = vpack.c.bf16 %v510_v37, %v510_v37  ;;  %v502_v46 = vadd.f32 %v1294_v18, %v501_v42  ;;  %v1146_v47 = vpop.f32.mrf.mxu0  ;;  %v1162_v50 = vpop.f32.mrf.mxu1  ;;  %v741_v52 = vmul.f32 %v510_v37, %v510_v37  ;;  %v755_v56 = vsel %vm754_vm2, %v722_v40, 0.0 }
  0xdd   : > { %693 = vst.msk [vmem:[%s1302_s30 + $0xc] sm:$0xf] %vm689_vm1, %v1089_v41  ;;  %v1087_v48 = vpack.c.bf16 %v438_v43, %v438_v43  ;;  %v459_v49 = vadd.f32 %v1146_v47, %v1294_v18  ;;  %v764_v51 = vsel %vm754_vm2, %v725_v44, 0.0  ;;  %v1328_v54 = vadd.f32 %v1162_v50, %v1294_v18 }
  0xde   : > { %709 = vst.msk [vmem:[%s1302_s30 + $0x4c] sm:$0xf] %vm689_vm1, %v1105_v45  ;;  %v1103_v53 = vpack.c.bf16 %v502_v46, %v502_v46  ;;  %765 = vadd.xlane.f32.xlu1 %v764_v51  ;;  %v450_v55 = vpop.f32.mrf.mxu0  ;;  %v514_v60 = vpop.f32.mrf.mxu1  ;;  %v812_v3 = vsel %vm754_vm2, %v741_v52, 0.0  ;;  %v739_v4 = vmul.f32 %v502_v46, %v502_v46  ;;  %v803_v8 = vsel %vm754_vm2, %v738_v57, 0.0 }
  0xdf   : > { %691 = vst.msk [vmem:[%s1302_s30 + $0x4] sm:$0xf] %vm689_vm1, %v1087_v48  ;;  %v1092_v58 = vpack.c.bf16 %v459_v49, %v459_v49  ;;  %v1334_v59 = vadd.f32 %v1294_v18, %v450_v55  ;;  %756 = vadd.xlane.f32.xlu0 %v755_v56  ;;  %v1108_v61 = vpack.c.bf16 %v1328_v54, %v1328_v54 }
  0xe0   : > { %707 = vst.msk [vmem:[%s1302_s30 + $0x44] sm:$0xf] %vm689_vm1, %v1103_v53  ;;  %v1147_v62 = vpop.f32.mrf.mxu0  ;;  %v1341_v63 = vadd.f32 %v1294_v18, %v514_v60  ;;  %v1163_v2 = vpop.f32.mrf.mxu1  ;;  %v723_v9 = vmul.f32 %v438_v43, %v438_v43  ;;  %v806_v17 = vsel %vm754_vm2, %v739_v4, 0.0  ;;  %v728_v24 = vmul.f32 %v459_v49, %v459_v49 }
  0xe1   : > { %696 = vst.msk [vmem:[%s1302_s30 + $0x18] sm:$0xf] %vm689_vm1, %v1092_v58  ;;  %v1090_v0 = vpack.c.bf16 %v1334_v59, %v1334_v59  ;;  %v462_v1 = vadd.f32 %v1147_v62, %v1294_v18  ;;  %712 = vst.msk [vmem:[%s1302_s30 + $0x58] sm:$0xf] %vm689_vm1, %v1108_v61  ;;  %v526_v6 = vadd.f32 %v1163_v2, %v1294_v18 }
  0xe2   : > { %v1106_v5 = vpack.c.bf16 %v1341_v63, %v1341_v63  ;;  %813 = vadd.xlane.f32.xlu1 %v812_v3  ;;  %v453_v7 = vpop.f32.mrf.mxu0  ;;  %v517_v12 = vpop.f32.mrf.mxu1  ;;  %v758_v23 = vsel %vm754_vm2, %v723_v9, 0.0  ;;  %v773_v38 = vsel %vm754_vm2, %v728_v24, 0.0  ;;  %v744_v39 = vmul.f32 %v1328_v54, %v1328_v54 }
  0xe3   : > { %694 = vst.msk [vmem:[%s1302_s30 + $0x10] sm:$0xf] %vm689_vm1, %v1090_v0  ;;  %v1093_v10 = vpack.c.bf16 %v462_v1, %v462_v1  ;;  %v454_v11 = vadd.f32 %v1294_v18, %v453_v7  ;;  %804 = vadd.xlane.f32.xlu0 %v803_v8  ;;  %v1109_v13 = vpack.c.bf16 %v526_v6, %v526_v6 }
  0xe4   : > { %710 = vst.msk [vmem:[%s1302_s30 + $0x50] sm:$0xf] %vm689_vm1, %v1106_v5  ;;  %v1361_v14 = vadd.f32 %v1294_v18, %v517_v12  ;;  %v1150_v15 = vpop.f32.mrf.mxu0  ;;  %v729_v19 = vmul.f32 %v462_v1, %v462_v1  ;;  %v1166_v21 = vpop.f32.mrf.mxu1  ;;  %v745_v35 = vmul.f32 %v526_v6, %v526_v6  ;;  %v821_v54 = vsel %vm754_vm2, %v744_v39, 0.0 }
  0xe5   : > { %697 = vst.msk [vmem:[%s1302_s30 + $0x1c] sm:$0xf] %vm689_vm1, %v1093_v10  ;;  %v1091_v16 = vpack.c.bf16 %v454_v11, %v454_v11  ;;  %v1367_v20 = vadd.f32 %v1150_v15, %v1294_v18  ;;  %713 = vst.msk [vmem:[%s1302_s30 + $0x5c] sm:$0xf] %vm689_vm1, %v1109_v13  ;;  %v1375_v26 = vadd.f32 %v1166_v21, %v1294_v18 }
  0xe6   : > { %v1107_v22 = vpack.c.bf16 %v1361_v14, %v1361_v14  ;;  %807 = vadd.xlane.f32.xlu1 %v806_v17  ;;  %v466_v25 = vpop.f32.mrf.mxu0  ;;  %v530_v29 = vpop.f32.mrf.mxu1  ;;  %v776_v33 = vsel %vm754_vm2, %v729_v19, 0.0  ;;  %v824_v49 = vsel %vm754_vm2, %v745_v35, 0.0  ;;  %v727_v51 = vmul.f32 %v454_v11, %v454_v11 }
  0xe7   : > { %695 = vst.msk [vmem:[%s1302_s30 + $0x14] sm:$0xf] %vm689_vm1, %v1091_v16  ;;  %759 = vadd.xlane.f32.xlu0 %v758_v23  ;;  %v1096_v27 = vpack.c.bf16 %v1367_v20, %v1367_v20  ;;  %v1382_v28 = vadd.f32 %v1294_v18, %v466_v25  ;;  %v1112_v30 = vpack.c.bf16 %v1375_v26, %v1375_v26 }
  0xe8   : > { %711 = vst.msk [vmem:[%s1302_s30 + $0x54] sm:$0xf] %vm689_vm1, %v1107_v22  ;;  %v1151_v31 = vpop.f32.mrf.mxu0  ;;  %v1389_v32 = vadd.f32 %v1294_v18, %v530_v29  ;;  %v1167_v37 = vpop.f32.mrf.mxu1  ;;  %v726_v55 = vmul.f32 %v1334_v59, %v1334_v59  ;;  %v770_v2 = vsel %vm754_vm2, %v727_v51, 0.0  ;;  %v743_v3 = vmul.f32 %v1361_v14, %v1361_v14 }
  0xe9   : > { %700 = vst.msk [vmem:[%s1302_s30 + $0x28] sm:$0xf] %vm689_vm1, %v1096_v27  ;;  %v1094_v34 = vpack.c.bf16 %v1382_v28, %v1382_v28  ;;  %v478_v36 = vadd.f32 %v1151_v31, %v1294_v18  ;;  %716 = vst.msk [vmem:[%s1302_s30 + $0x68] sm:$0xf] %vm689_vm1, %v1112_v30  ;;  %v1405_v42 = vadd.f32 %v1167_v37, %v1294_v18 }
  0xea   : > { %777 = vadd.xlane.f32.xlu1 %v776_v33  ;;  %v469_v40 = vpop.f32.mrf.mxu0  ;;  %v1110_v41 = vpack.c.bf16 %v1389_v32, %v1389_v32  ;;  %v533_v45 = vpop.f32.mrf.mxu1  ;;  %v767_v7 = vsel %vm754_vm2, %v726_v55, 0.0  ;;  %v742_v8 = vmul.f32 %v1341_v63, %v1341_v63  ;;  %v818_v16 = vsel %vm754_vm2, %v743_v3, 0.0 }
  0xeb   : > { %774 = vadd.xlane.f32.xlu0 %v773_v38  ;;  %698 = vst.msk [vmem:[%s1302_s30 + $0x20] sm:$0xf] %vm689_vm1, %v1094_v34  ;;  %v1097_v43 = vpack.c.bf16 %v478_v36, %v478_v36  ;;  %v1410_v44 = vadd.f32 %v1294_v18, %v469_v40  ;;  %v1113_v46 = vpack.c.bf16 %v1405_v42, %v1405_v42 }
  0xec   : > { %714 = vst.msk [vmem:[%s1302_s30 + $0x60] sm:$0xf] %vm689_vm1, %v1110_v41  ;;  %v1417_v47 = vadd.f32 %v1294_v18, %v533_v45  ;;  %v1154_v48 = vpop.f32.mrf.mxu0  ;;  %v1170_v53 = vpop.f32.mrf.mxu1  ;;  %v733_v17 = vmul.f32 %v478_v36, %v478_v36  ;;  %v815_v21 = vsel %vm754_vm2, %v742_v8, 0.0  ;;  %v732_v22 = vmul.f32 %v1367_v20, %v1367_v20 }
  0xed   : > { %701 = vst.msk [vmem:[%s1302_s30 + $0x2c] sm:$0xf] %vm689_vm1, %v1097_v43  ;;  %v1095_v50 = vpack.c.bf16 %v1410_v44, %v1410_v44  ;;  %v1425_v52 = vadd.f32 %v1154_v48, %v1294_v18  ;;  %717 = vst.msk [vmem:[%s1302_s30 + $0x6c] sm:$0xf] %vm689_vm1, %v1113_v46  ;;  %v1435_v58 = vadd.f32 %v1170_v53, %v1294_v18 }
  0xee   : > { %825 = vadd.xlane.f32.xlu1 %v824_v49  ;;  %v1111_v56 = vpack.c.bf16 %v1417_v47, %v1417_v47  ;;  %v482_v57 = vpop.f32.mrf.mxu0  ;;  %v546_v62 = vpop.f32.mrf.mxu1  ;;  %v749_v24 = vmul.f32 %v1405_v42, %v1405_v42  ;;  %v785_v25 = vsel %vm754_vm2, %v732_v22, 0.0  ;;  %v748_v27 = vmul.f32 %v1375_v26, %v1375_v26 }
  0xef   : > { %822 = vadd.xlane.f32.xlu0 %v821_v54  ;;  %699 = vst.msk [vmem:[%s1302_s30 + $0x24] sm:$0xf] %vm689_vm1, %v1095_v50  ;;  %v1100_v60 = vpack.c.bf16 %v1425_v52, %v1425_v52  ;;  %v1442_v61 = vadd.f32 %v1294_v18, %v482_v57  ;;  %v1116_v0 = vpack.c.bf16 %v1435_v58, %v1435_v58 }
  0xf0   : > { %715 = vst.msk [vmem:[%s1302_s30 + $0x64] sm:$0xf] %vm689_vm1, %v1111_v56  ;;  %v1155_v59 = vpop.f32.mrf.mxu0  ;;  %v1449_v1 = vadd.f32 %v1294_v18, %v546_v62  ;;  %v1171_v6 = vpop.f32.mrf.mxu1  ;;  %v836_v20 = vsel %vm754_vm2, %v749_v24, 0.0  ;;  %v731_v29 = vmul.f32 %v1410_v44, %v1410_v44  ;;  %v833_v30 = vsel %vm754_vm2, %v748_v27, 0.0 }
  0xf1   : > { %704 = vst.msk [vmem:[%s1302_s30 + $0x38] sm:$0xf] %vm689_vm1, %v1100_v60  ;;  %v1098_v4 = vpack.c.bf16 %v1442_v61, %v1442_v61  ;;  %v494_v5 = vadd.f32 %v1155_v59, %v1294_v18  ;;  %720 = vst.msk [vmem:[%s1302_s30 + $0x78] sm:$0xf] %vm689_vm1, %v1116_v0  ;;  %v558_v11 = vadd.f32 %v1171_v6, %v1294_v18 }
  0xf2   : > { %771 = vadd.xlane.f32.xlu1 %v770_v2  ;;  %v485_v9 = vpop.f32.mrf.mxu0  ;;  %v1114_v10 = vpack.c.bf16 %v1449_v1, %v1449_v1  ;;  %v549_v14 = vpop.f32.mrf.mxu1  ;;  %v730_v31 = vmul.f32 %v1382_v28, %v1382_v28  ;;  %v782_v33 = vsel %vm754_vm2, %v731_v29, 0.0  ;;  %v747_v34 = vmul.f32 %v1417_v47, %v1417_v47 }
  0xf3   : > { %768 = vadd.xlane.f32.xlu0 %v767_v7  ;;  %702 = vst.msk [vmem:[%s1302_s30 + $0x30] sm:$0xf] %vm689_vm1, %v1098_v4  ;;  %v1101_v12 = vpack.c.bf16 %v494_v5, %v494_v5  ;;  %v486_v13 = vadd.f32 %v1294_v18, %v485_v9  ;;  %v1117_v63 = vpack.c.bf16 %v558_v11, %v558_v11 }
  0xf4   : > { %718 = vst.msk [vmem:[%s1302_s30 + $0x70] sm:$0xf] %vm689_vm1, %v1114_v10  ;;  %v550_v15 = vadd.f32 %v1294_v18, %v549_v14  ;;  %v788_v18 = vsel %vm754_vm2, %v733_v17, 0.0  ;;  %v779_v26 = vsel %vm754_vm2, %v730_v31, 0.0  ;;  %v746_v35 = vmul.f32 %v1389_v32, %v1389_v32 }
  0xf5   : > { %705 = vst.msk [vmem:[%s1302_s30 + $0x3c] sm:$0xf] %vm689_vm1, %v1101_v12  ;;  %v1099_v19 = vpack.c.bf16 %v486_v13, %v486_v13  ;;  %721 = vst.msk [vmem:[%s1302_s30 + $0x7c] sm:$0xf] %vm689_vm1, %v1117_v63  ;;  %v830_v36 = vsel %vm754_vm2, %v747_v34, 0.0  ;;  %v737_v37 = vmul.f32 %v494_v5, %v494_v5  ;;  %v736_v28 = vmul.f32 %v1425_v52, %v1425_v52 }
  0xf6   : > { %819 = vadd.xlane.f32.xlu1 %v818_v16  ;;  %v1115_v23 = vpack.c.bf16 %v550_v15, %v550_v15  ;;  %v827_v38 = vsel %vm754_vm2, %v746_v35, 0.0  ;;  %v735_v40 = vmul.f32 %v486_v13, %v486_v13  ;;  %v734_v32 = vmul.f32 %v1442_v61, %v1442_v61 }
  0xf7   : > { %816 = vadd.xlane.f32.xlu0 %v815_v21  ;;  %703 = vst.msk [vmem:[%s1302_s30 + $0x34] sm:$0xf] %vm689_vm1, %v1099_v19  ;;  %v800_v39 = vsel %vm754_vm2, %v737_v37, 0.0  ;;  %v797_v41 = vsel %vm754_vm2, %v736_v28, 0.0  ;;  %v751_v43 = vmul.f32 %v550_v15, %v550_v15  ;;  %v750_v45 = vmul.f32 %v1449_v1, %v1449_v1 }
  0xf8   : > { %719 = vst.msk [vmem:[%s1302_s30 + $0x74] sm:$0xf] %vm689_vm1, %v1115_v23  ;;  %v794_v42 = vsel %vm754_vm2, %v735_v40, 0.0  ;;  %v791_v44 = vsel %vm754_vm2, %v734_v32, 0.0  ;;  %v753_v47 = vmul.f32 %v558_v11, %v558_v11  ;;  %v752_v49 = vmul.f32 %v1435_v58, %v1435_v58 }
  0xf9   : > { %v842_v46 = vsel %vm754_vm2, %v751_v43, 0.0  ;;  %v839_v48 = vsel %vm754_vm2, %v750_v45, 0.0 }
  0xfa   : > { %789 = vadd.xlane.f32.xlu1 %v788_v18  ;;  %v848_v50 = vsel %vm754_vm2, %v753_v47, 0.0  ;;  %v845_v51 = vsel %vm754_vm2, %v752_v49, 0.0 }
  0xfb   : > { %786 = vadd.xlane.f32.xlu0 %v785_v25 }
  0xfe   : > { %837 = vadd.xlane.f32.xlu1 %v836_v20 }
  0xff   : > { %834 = vadd.xlane.f32.xlu0 %v833_v30 }
 0x102   : > { %783 = vadd.xlane.f32.xlu1 %v782_v33 }
 0x103   : > { %780 = vadd.xlane.f32.xlu0 %v779_v26 }
 0x106   : > { %831 = vadd.xlane.f32.xlu1 %v830_v36 }
 0x107   : > { %828 = vadd.xlane.f32.xlu0 %v827_v38 }
 0x10a   : > { %801 = vadd.xlane.f32.xlu1 %v800_v39 }
 0x10b   : > { %798 = vadd.xlane.f32.xlu0 %v797_v41 }
 0x10e   : > { %795 = vadd.xlane.f32.xlu1 %v794_v42 }
 0x10f   : > { %792 = vadd.xlane.f32.xlu0 %v791_v44 }
 0x112   : > { %843 = vadd.xlane.f32.xlu1 %v842_v46 }
 0x113   : > { %840 = vadd.xlane.f32.xlu0 %v839_v48 }
 0x116   : > { %849 = vadd.xlane.f32.xlu1 %v848_v50 }
 0x117   : > { %846 = vadd.xlane.f32.xlu0 %v845_v51 }
 0x163   : > { %v763_v52 = vpop.xlane.xlu1 %762 }
 0x164   : > { %v811_v53 = vpop.xlane.xlu0 %810  ;;  %v853_v54 = vmul.f32 0.5, %v763_v52 }
 0x165   : > { %v869_v55 = vmul.f32 0.5, %v811_v53 }
 0x166   : > { %886 = vst.msk [vmem:[%s1525_s8 + $0x10] sm:$0xff] %vm883_vm3, %v853_v54 }
 0x167   : > { %902 = vst.msk [vmem:[%s1525_s8 + $0x90] sm:$0xff] %vm883_vm3, %v869_v55  ;;  %v766_v56 = vpop.xlane.xlu1 %765 }
 0x168   : > { %v854_v57 = vmul.f32 0.5, %v766_v56  ;;  %v757_v58 = vpop.xlane.xlu0 %756 }
 0x169   : > { %v851_v60 = vmul.f32 0.5, %v757_v58 }
 0x16a   : > { %887 = vst.msk [vmem:[%s1525_s8 + $0x18] sm:$0xff] %vm883_vm3, %v854_v57 }
 0x16b   : > { %884 = vst.msk [vmem:[%s1525_s8] sm:$0xff] %vm883_vm3, %v851_v60  ;;  %v814_v61 = vpop.xlane.xlu1 %813 }
 0x16c   : > { %v870_v62 = vmul.f32 0.5, %v814_v61  ;;  %v805_v59 = vpop.xlane.xlu0 %804 }
 0x16d   : > { %v867_v0 = vmul.f32 0.5, %v805_v59 }
 0x16e   : > { %903 = vst.msk [vmem:[%s1525_s8 + $0x98] sm:$0xff] %vm883_vm3, %v870_v62 }
 0x16f   : > { %900 = vst.msk [vmem:[%s1525_s8 + $0x80] sm:$0xff] %vm883_vm3, %v867_v0  ;;  %v808_v1 = vpop.xlane.xlu1 %807 }
 0x170   : > { %v868_v2 = vmul.f32 0.5, %v808_v1  ;;  %v760_v3 = vpop.xlane.xlu0 %759 }
 0x171   : > { %v852_v4 = vmul.f32 0.5, %v760_v3 }
 0x172   : > { %901 = vst.msk [vmem:[%s1525_s8 + $0x88] sm:$0xff] %vm883_vm3, %v868_v2 }
 0x173   : > { %885 = vst.msk [vmem:[%s1525_s8 + $0x8] sm:$0xff] %vm883_vm3, %v852_v4  ;;  %v778_v5 = vpop.xlane.xlu1 %777 }
 0x174   : > { %v858_v6 = vmul.f32 0.5, %v778_v5  ;;  %v775_v7 = vpop.xlane.xlu0 %774 }
 0x175   : > { %v857_v8 = vmul.f32 0.5, %v775_v7 }
 0x176   : > { %891 = vst.msk [vmem:[%s1525_s8 + $0x38] sm:$0xff] %vm883_vm3, %v858_v6 }
 0x177   : > { %890 = vst.msk [vmem:[%s1525_s8 + $0x30] sm:$0xff] %vm883_vm3, %v857_v8  ;;  %v826_v9 = vpop.xlane.xlu1 %825 }
 0x178   : > { %v874_v10 = vmul.f32 0.5, %v826_v9  ;;  %v823_v11 = vpop.xlane.xlu0 %822 }
 0x179   : > { %v873_v12 = vmul.f32 0.5, %v823_v11 }
 0x17a   : > { %907 = vst.msk [vmem:[%s1525_s8 + $0xb8] sm:$0xff] %vm883_vm3, %v874_v10 }
 0x17b   : > { %906 = vst.msk [vmem:[%s1525_s8 + $0xb0] sm:$0xff] %vm883_vm3, %v873_v12  ;;  %v772_v13 = vpop.xlane.xlu1 %771 }
 0x17c   : > { %v856_v14 = vmul.f32 0.5, %v772_v13  ;;  %v769_v63 = vpop.xlane.xlu0 %768 }
 0x17d   : > { %v855_v15 = vmul.f32 0.5, %v769_v63 }
 0x17e   : > { %889 = vst.msk [vmem:[%s1525_s8 + $0x28] sm:$0xff] %vm883_vm3, %v856_v14 }
 0x17f   : > { %888 = vst.msk [vmem:[%s1525_s8 + $0x20] sm:$0xff] %vm883_vm3, %v855_v15  ;;  %v820_v16 = vpop.xlane.xlu1 %819 }
 0x180   : > { %v872_v17 = vmul.f32 0.5, %v820_v16  ;;  %v817_v19 = vpop.xlane.xlu0 %816 }
 0x181   : > { %v871_v21 = vmul.f32 0.5, %v817_v19 }
 0x182   : > { %905 = vst.msk [vmem:[%s1525_s8 + $0xa8] sm:$0xff] %vm883_vm3, %v872_v17 }
 0x183   : > { %904 = vst.msk [vmem:[%s1525_s8 + $0xa0] sm:$0xff] %vm883_vm3, %v871_v21  ;;  %v790_v22 = vpop.xlane.xlu1 %789 }
 0x184   : > { %v862_v23 = vmul.f32 0.5, %v790_v22  ;;  %v787_v18 = vpop.xlane.xlu0 %786 }
 0x185   : > { %v861_v24 = vmul.f32 0.5, %v787_v18 }
 0x186   : > { %895 = vst.msk [vmem:[%s1525_s8 + $0x58] sm:$0xff] %vm883_vm3, %v862_v23 }
 0x187   : > { %894 = vst.msk [vmem:[%s1525_s8 + $0x50] sm:$0xff] %vm883_vm3, %v861_v24  ;;  %v838_v25 = vpop.xlane.xlu1 %837 }
 0x188   : > { %v878_v27 = vmul.f32 0.5, %v838_v25  ;;  %v835_v20 = vpop.xlane.xlu0 %834 }
 0x189   : > { %v877_v29 = vmul.f32 0.5, %v835_v20 }
 0x18a   : > { %911 = vst.msk [vmem:[%s1525_s8 + $0xd8] sm:$0xff] %vm883_vm3, %v878_v27 }
 0x18b   : > { %910 = vst.msk [vmem:[%s1525_s8 + $0xd0] sm:$0xff] %vm883_vm3, %v877_v29  ;;  %v784_v30 = vpop.xlane.xlu1 %783 }
 0x18c   : > { %v860_v31 = vmul.f32 0.5, %v784_v30  ;;  %v781_v33 = vpop.xlane.xlu0 %780 }
 0x18d   : > { %v859_v34 = vmul.f32 0.5, %v781_v33 }
 0x18e   : > { %893 = vst.msk [vmem:[%s1525_s8 + $0x48] sm:$0xff] %vm883_vm3, %v860_v31 }
 0x18f   : > { %892 = vst.msk [vmem:[%s1525_s8 + $0x40] sm:$0xff] %vm883_vm3, %v859_v34  ;;  %v832_v26 = vpop.xlane.xlu1 %831 }
 0x190   : > { %v876_v35 = vmul.f32 0.5, %v832_v26  ;;  %v829_v36 = vpop.xlane.xlu0 %828 }
 0x191   : > { %v875_v37 = vmul.f32 0.5, %v829_v36 }
 0x192   : > { %909 = vst.msk [vmem:[%s1525_s8 + $0xc8] sm:$0xff] %vm883_vm3, %v876_v35 }
 0x193   : > { %908 = vst.msk [vmem:[%s1525_s8 + $0xc0] sm:$0xff] %vm883_vm3, %v875_v37  ;;  %v802_v38 = vpop.xlane.xlu1 %801 }
 0x194   : > { %v866_v28 = vmul.f32 0.5, %v802_v38  ;;  %v799_v39 = vpop.xlane.xlu0 %798 }
 0x195   : > { %v865_v40 = vmul.f32 0.5, %v799_v39 }
 0x196   : > { %899 = vst.msk [vmem:[%s1525_s8 + $0x78] sm:$0xff] %vm883_vm3, %v866_v28 }
 0x197   : > { %898 = vst.msk [vmem:[%s1525_s8 + $0x70] sm:$0xff] %vm883_vm3, %v865_v40  ;;  %v796_v41 = vpop.xlane.xlu1 %795 }
 0x198   : > { %v864_v32 = vmul.f32 0.5, %v796_v41  ;;  %v793_v42 = vpop.xlane.xlu0 %792 }
 0x199   : > { %v863_v43 = vmul.f32 0.5, %v793_v42 }
 0x19a   : > { %897 = vst.msk [vmem:[%s1525_s8 + $0x68] sm:$0xff] %vm883_vm3, %v864_v32 }
 0x19b   : > { %896 = vst.msk [vmem:[%s1525_s8 + $0x60] sm:$0xff] %vm883_vm3, %v863_v43  ;;  %v844_v44 = vpop.xlane.xlu1 %843 }
 0x19c   : > { %v880_v45 = vmul.f32 0.5, %v844_v44  ;;  %v841_v46 = vpop.xlane.xlu0 %840 }
 0x19d   : > { %v879_v47 = vmul.f32 0.5, %v841_v46 }
 0x19e   : > { %913 = vst.msk [vmem:[%s1525_s8 + $0xe8] sm:$0xff] %vm883_vm3, %v880_v45 }
 0x19f   : > { %912 = vst.msk [vmem:[%s1525_s8 + $0xe0] sm:$0xff] %vm883_vm3, %v879_v47  ;;  %v850_v48 = vpop.xlane.xlu1 %849 }
 0x1a0   : > { %v882_v49 = vmul.f32 0.5, %v850_v48  ;;  %v847_v50 = vpop.xlane.xlu0 %846 }
 0x1a1   : > { %v881_v51 = vmul.f32 0.5, %v847_v50 }
 0x1a2   : > { %915 = vst.msk [vmem:[%s1525_s8 + $0xf8] sm:$0xff] %vm883_vm3, %v882_v49 }
 0x1a3   : > { %914 = vst.msk [vmem:[%s1525_s8 + $0xf0] sm:$0xff] %vm883_vm3, %v881_v51 }
 0x1a4 PF: > { %s15_s15 = sadd.s32 1, %s1208_s15  }
 0x1a5   : > { %p12_p4 = scmp.ge.s32.totalorder %s15_s15, 4  }
 0x1a7   :  { %14 = sbr.rel (!%p12_p4) target bundleno = 1 (0x1), region = 74 }

</bundles_post_ra>
